<compile_context>
chip_gen: v7x
topology: tpu7x:2x2x1
jax: 0.10.0
libtpu: 0.0.40
codegen_flags: <defaults>
</compile_context>

<pallas_src>
import functools

import jax
import jax.numpy as jnp
from jax.experimental import pallas as pl
from jax.experimental.pallas import tpu as pltpu


def _round_up(n, m):
    return ((n + m - 1) // m) * m


# --------------------------------------------------------------------------
# Kernel
# --------------------------------------------------------------------------
def _actor_kernel(num_actions, min_log_std, max_log_std, matmul_dtype,
                  x_ref, w1_ref, b1_ref, w2_ref, b2_ref, wh_ref, bh_ref,
                  out_ref):
    # fc1 + relu  (bf16 MXU inputs, f32 accumulate; elementwise in f32 -> v5e safe)
    x = x_ref[...].astype(matmul_dtype)
    h1 = jnp.dot(x, w1_ref[...], preferred_element_type=jnp.float32) + b1_ref[...]
    h1 = jnp.maximum(h1, 0.0)

    # fc2 + relu
    h2 = jnp.dot(h1.astype(matmul_dtype), w2_ref[...],
                 preferred_element_type=jnp.float32) + b2_ref[...]
    h2 = jnp.maximum(h2, 0.0)

    # Fused heads: columns [0, A) are mu, columns [A, 2A) are log_std,
    # columns [2A, head_pad) are zero padding (never stored).
    head = jnp.dot(h2.astype(matmul_dtype), wh_ref[...],
                   preferred_element_type=jnp.float32) + bh_ref[...]

    # relu (+ clamp) only on the log_std lanes.  relu output is >= 0, so the
    # lower clamp is only needed if min_log_std > 0 (trace-time decision).
    col = jax.lax.broadcasted_iota(jnp.int32, head.shape, dimension=1)
    is_log_std = (col >= num_actions) & (col < 2 * num_actions)
    ls = jnp.maximum(head, 0.0)
    if min_log_std > 0.0:
        ls = jnp.maximum(ls, min_log_std)
    ls = jnp.minimum(ls, max_log_std)
    slab = jnp.where(is_log_std, ls, head)            # (tile_b, head_pad) f32

    # Transpose with the XLU (otherwise idle here) so the batch axis becomes
    # the lane axis of the output, then store only the 2A useful rows.
    slab_t = slab.T                                    # (head_pad, tile_b)
    out_ref[...] = slab_t[:2 * num_actions, :].astype(out_ref.dtype)


# --------------------------------------------------------------------------
# One-time parameter packing (NOT on the per-step hot path)
# --------------------------------------------------------------------------
def pack_actor_params(params, *, matmul_dtype=jnp.bfloat16):
    """Fuse + lane-pad the two head layers and cast matmul weights.

    Call once after (re)initializing / updating weights; pass the result to
    `actor_forward`.  Biases stay f32 (elementwise math stays f32 in-kernel).
    """
    num_actions = params["wmu"].shape[1]
    head_pad = max(128, _round_up(2 * num_actions, 128))
    w_heads = jnp.concatenate([params["wmu"], params["wls"]], axis=1)
    w_heads = jnp.pad(w_heads, ((0, 0), (0, head_pad - 2 * num_actions)))
    b_heads = jnp.concatenate([params["bmu"], params["bls"]], axis=1)
    b_heads = jnp.pad(b_heads, ((0, 0), (0, head_pad - 2 * num_actions)))
    return dict(
        w1=params["w1"].astype(matmul_dtype),
        b1=params["b1"].astype(jnp.float32),
        w2=params["w2"].astype(matmul_dtype),
        b2=params["b2"].astype(jnp.float32),
        wh=w_heads.astype(matmul_dtype),
        bh=b_heads.astype(jnp.float32),
        num_actions=int(num_actions),
        matmul_dtype=matmul_dtype,
    )


# --------------------------------------------------------------------------
# Forward wrapper
# --------------------------------------------------------------------------
def actor_forward(x, packed, *, min_log_std=-10.0, max_log_std=2.0,
                  max_tile_b=2048):
    """Run the Actor forward pass as a single Pallas kernel.

    x:       (B, state_dim) float32
    packed:  output of `pack_actor_params`
    Returns (mu, log_std), both (B, num_actions) float32.
    """
    B, state_dim = x.shape
    hidden_dim = packed["w1"].shape[1]
    head_pad = packed["wh"].shape[1]
    num_actions = packed["num_actions"]

    # ---- batch tiling ----------------------------------------------------
    # Large, 128-aligned batch tiles (per-grid-step overhead dominates this
    # tiny per-row workload), but keep >= 2 steps for B > 128 so the parallel
    # axis can be sharded across v7x's 2 TensorCores.
    tile_cap = max(128, _round_up(max_tile_b, 128))
    b_al8 = _round_up(B, 8)
    if b_al8 <= 128:
        tile_b = b_al8                       # single step, full-extent blocks
        b_pad = b_al8
    else:
        b_128 = _round_up(B, 128)
        tile_b = min(tile_cap, max(128, (b_128 // 2 // 128) * 128))
        b_pad = _round_up(B, tile_b)
    grid = (b_pad // tile_b,)

    x_p = jnp.pad(x, ((0, b_pad - B), (0, 0))) if b_pad != B else x

    kernel = functools.partial(
        _actor_kernel, int(num_actions), float(min_log_std),
        float(max_log_std), packed["matmul_dtype"])

    resident = lambda shape: pl.BlockSpec(shape, lambda i: (0, 0))
    out = pl.pallas_call(
        kernel,
        # Transposed output: rows = [mu_0..mu_{A-1}, ls_0..ls_{A-1}], lanes = batch.
        out_shape=jax.ShapeDtypeStruct((2 * num_actions, b_pad), jnp.float32),
        grid=grid,
        in_specs=[
            pl.BlockSpec((tile_b, state_dim), lambda i: (i, 0)),   # x tile
            resident((state_dim, hidden_dim)),                     # w1 (bf16)
            resident((1, hidden_dim)),                             # b1 (f32)
            resident((hidden_dim, hidden_dim)),                    # w2 (bf16)
            resident((1, hidden_dim)),                             # b2 (f32)
            resident((hidden_dim, head_pad)),                      # fused heads W
            resident((1, head_pad)),                               # fused heads b
        ],
        out_specs=pl.BlockSpec((2 * num_actions, tile_b), lambda i: (0, i)),
        compiler_params=pltpu.CompilerParams(
            dimension_semantics=("parallel",)),                    # v7x: 2 TCs
    )(
        x_p,
        packed["w1"], packed["b1"],
        packed["w2"], packed["b2"],
        packed["wh"], packed["bh"],
    )

    mu = out[:num_actions, :B].T
    log_std = out[num_actions:2 * num_actions, :B].T
    return mu, log_std


# --------------------------------------------------------------------------
# Init / reference / test
# --------------------------------------------------------------------------
def init_actor_params(key, state_dim, num_actions, hidden_dim):
    """Deterministic PyTorch-style (uniform +-1/sqrt(fan_in)) init, f32."""
    def linear(key, fan_in, fan_out):
        kw, kb = jax.random.split(key)
        bound = 1.0 / jnp.sqrt(float(fan_in))
        w = jax.random.uniform(kw, (fan_in, fan_out), jnp.float32, -bound, bound)
        b = jax.random.uniform(kb, (1, fan_out), jnp.float32, -bound, bound)
        return w, b

    k1, k2, k3, k4 = jax.random.split(key, 4)
    w1, b1 = linear(k1, state_dim, hidden_dim)
    w2, b2 = linear(k2, hidden_dim, hidden_dim)
    wmu, bmu = linear(k3, hidden_dim, num_actions)
    wls, bls = linear(k4, hidden_dim, num_actions)
    return dict(w1=w1, b1=b1, w2=w2, b2=b2, wmu=wmu, bmu=bmu, wls=wls, bls=bls)


def _reference_forward(x, p, min_log_std=-10.0, max_log_std=2.0):
    h1 = jnp.maximum(x @ p["w1"] + p["b1"], 0.0)
    h2 = jnp.maximum(h1 @ p["w2"] + p["b2"], 0.0)
    mu = h2 @ p["wmu"] + p["bmu"]
    ls = jnp.clip(jnp.maximum(h2 @ p["wls"] + p["bls"], 0.0), min_log_std, max_log_std)
    return mu, ls


if __name__ == "__main__":
    # Small shapes consistent with the module: batch=8, state_dim=16,
    # hidden_dim=32, num_actions=4.
    B, STATE_DIM, HIDDEN_DIM, NUM_ACTIONS = 8, 16, 32, 4

    key = jax.random.PRNGKey(0)
    kx, kp, kx2 = jax.random.split(key, 3)
    x = jax.random.normal(kx, (B, STATE_DIM), jnp.float32)
    params = init_actor_params(kp, STATE_DIM, NUM_ACTIONS, HIDDEN_DIM)
    packed = pack_actor_params(params)          # one-time packing (off hot path)

    # --- small-batch path (single grid step) -----------------------------
    mu, log_std = actor_forward(x, packed)
    jax.block_until_ready((mu, log_std))

    mu_ref, ls_ref = _reference_forward(x, params)
    assert mu.shape == (B, NUM_ACTIONS) and log_std.shape == (B, NUM_ACTIONS)
    # bf16 MXU inputs vs f32 reference -> loosened tolerance (expected, not a bug).
    assert jnp.allclose(mu, mu_ref, atol=5e-2, rtol=5e-2)
    assert jnp.allclose(log_std, ls_ref, atol=5e-2, rtol=5e-2)

    # --- multi-tile path (exercises 128-aligned tiling + batch padding) ---
    B2 = 300
    x2 = jax.random.normal(kx2, (B2, STATE_DIM), jnp.float32)
    mu2, ls2 = actor_forward(x2, packed)
    jax.block_until_ready((mu2, ls2))
    mu2_ref, ls2_ref = _reference_forward(x2, params)
    assert mu2.shape == (B2, NUM_ACTIONS) and ls2.shape == (B2, NUM_ACTIONS)
    assert jnp.allclose(mu2, mu2_ref, atol=5e-2, rtol=5e-2)
    assert jnp.allclose(ls2, ls2_ref, atol=5e-2, rtol=5e-2)

    print("KERNEL_OK")
</pallas_src>

<mosaic_0001>
module attributes {stable_mosaic.version = 11 : i64} {
  func.func @_actor_kernel(%arg0: i32, %arg1: memref<8x16xf32, #tpu.memory_space<vmem>>, %arg2: memref<16x32xbf16, #tpu.memory_space<vmem>>, %arg3: memref<1x32xf32, #tpu.memory_space<vmem>>, %arg4: memref<32x32xbf16, #tpu.memory_space<vmem>>, %arg5: memref<1x32xf32, #tpu.memory_space<vmem>>, %arg6: memref<32x128xbf16, #tpu.memory_space<vmem>>, %arg7: memref<1x128xf32, #tpu.memory_space<vmem>>, %arg8: memref<8x8xf32, #tpu.memory_space<vmem>>) attributes {dimension_semantics = [#tpu.dimension_semantics<parallel>], iteration_bounds = array<i64: 1>, scalar_prefetch = 0 : i64, scratch_operands = 0 : i64, tpu.core_type = #tpu.core_type<tc>, window_params = [{transform_indices = @transform_0, window_bounds = array<i64: 8, 16>}, {pipeline_mode = #tpu.pipeline_mode<synchronous>, transform_indices = @transform_1, window_bounds = array<i64: 16, 32>}, {pipeline_mode = #tpu.pipeline_mode<synchronous>, transform_indices = @transform_2, window_bounds = array<i64: 1, 32>}, {pipeline_mode = #tpu.pipeline_mode<synchronous>, transform_indices = @transform_3, window_bounds = array<i64: 32, 32>}, {pipeline_mode = #tpu.pipeline_mode<synchronous>, transform_indices = @transform_4, window_bounds = array<i64: 1, 32>}, {pipeline_mode = #tpu.pipeline_mode<synchronous>, transform_indices = @transform_5, window_bounds = array<i64: 32, 128>}, {pipeline_mode = #tpu.pipeline_mode<synchronous>, transform_indices = @transform_6, window_bounds = array<i64: 1, 128>}, {transform_indices = @transform_7, window_bounds = array<i64: 8, 8>}]} {
    %c0 = arith.constant 0 : index
    %c0_0 = arith.constant 0 : index
    %0 = vector.load %arg1[%c0, %c0_0] : memref<8x16xf32, #tpu.memory_space<vmem>>, vector<8x16xf32>
    %1 = arith.truncf %0 : vector<8x16xf32> to vector<8x16xbf16>
    %c0_1 = arith.constant 0 : index
    %c0_2 = arith.constant 0 : index
    %2 = vector.load %arg2[%c0_1, %c0_2] : memref<16x32xbf16, #tpu.memory_space<vmem>>, vector<16x32xbf16>
    %cst = arith.constant dense<0.000000e+00> : vector<8x32xf32>
    %3 = tpu.matmul %1, %2, %cst {dimension_numbers = #tpu.dot_dimension_numbers<[1], [0], [0], [1], [0, 0, 1, 1], [], []>} : vector<8x16xbf16>, vector<16x32xbf16>, vector<8x32xf32> -> vector<8x32xf32>
    %c0_3 = arith.constant 0 : index
    %c0_4 = arith.constant 0 : index
    %4 = vector.load %arg3[%c0_3, %c0_4] : memref<1x32xf32, #tpu.memory_space<vmem>>, vector<1x32xf32>
    %5 = vector.broadcast %4 : vector<1x32xf32> to vector<8x32xf32>
    %6 = arith.addf %3, %5 : vector<8x32xf32>
    %cst_5 = arith.constant 0.000000e+00 : f32
    %7 = vector.broadcast %cst_5 : f32 to vector<8x32xf32>
    %8 = arith.maximumf %6, %7 : vector<8x32xf32>
    %9 = arith.truncf %8 : vector<8x32xf32> to vector<8x32xbf16>
    %c0_6 = arith.constant 0 : index
    %c0_7 = arith.constant 0 : index
    %10 = vector.load %arg4[%c0_6, %c0_7] : memref<32x32xbf16, #tpu.memory_space<vmem>>, vector<32x32xbf16>
    %cst_8 = arith.constant dense<0.000000e+00> : vector<8x32xf32>
    %11 = tpu.matmul %9, %10, %cst_8 {dimension_numbers = #tpu.dot_dimension_numbers<[1], [0], [0], [1], [0, 0, 1, 1], [], []>} : vector<8x32xbf16>, vector<32x32xbf16>, vector<8x32xf32> -> vector<8x32xf32>
    %c0_9 = arith.constant 0 : index
    %c0_10 = arith.constant 0 : index
    %12 = vector.load %arg5[%c0_9, %c0_10] : memref<1x32xf32, #tpu.memory_space<vmem>>, vector<1x32xf32>
    %13 = vector.broadcast %12 : vector<1x32xf32> to vector<8x32xf32>
    %14 = arith.addf %11, %13 : vector<8x32xf32>
    %cst_11 = arith.constant 0.000000e+00 : f32
    %15 = vector.broadcast %cst_11 : f32 to vector<8x32xf32>
    %16 = arith.maximumf %14, %15 : vector<8x32xf32>
    %17 = arith.truncf %16 : vector<8x32xf32> to vector<8x32xbf16>
    %c0_12 = arith.constant 0 : index
    %c0_13 = arith.constant 0 : index
    %18 = vector.load %arg6[%c0_12, %c0_13] : memref<32x128xbf16, #tpu.memory_space<vmem>>, vector<32x128xbf16>
    %cst_14 = arith.constant dense<0.000000e+00> : vector<8x128xf32>
    %19 = tpu.matmul %17, %18, %cst_14 {dimension_numbers = #tpu.dot_dimension_numbers<[1], [0], [0], [1], [0, 0, 1, 1], [], []>} : vector<8x32xbf16>, vector<32x128xbf16>, vector<8x128xf32> -> vector<8x128xf32>
    %c0_15 = arith.constant 0 : index
    %c0_16 = arith.constant 0 : index
    %20 = vector.load %arg7[%c0_15, %c0_16] : memref<1x128xf32, #tpu.memory_space<vmem>>, vector<1x128xf32>
    %21 = vector.broadcast %20 : vector<1x128xf32> to vector<8x128xf32>
    %22 = arith.addf %19, %21 : vector<8x128xf32>
    %23 = tpu.iota {dimensions = array<i32: 1>} : vector<8x128xi32>
    %c4_i32 = arith.constant 4 : i32
    %24 = vector.broadcast %c4_i32 : i32 to vector<8x128xi32>
    %25 = arith.cmpi sge, %23, %24 : vector<8x128xi32>
    %c8_i32 = arith.constant 8 : i32
    %26 = vector.broadcast %c8_i32 : i32 to vector<8x128xi32>
    %27 = arith.cmpi slt, %23, %26 : vector<8x128xi32>
    %28 = arith.andi %25, %27 : vector<8x128xi1>
    %cst_17 = arith.constant 0.000000e+00 : f32
    %29 = vector.broadcast %cst_17 : f32 to vector<8x128xf32>
    %30 = arith.maximumf %22, %29 : vector<8x128xf32>
    %cst_18 = arith.constant 2.000000e+00 : f32
    %31 = vector.broadcast %cst_18 : f32 to vector<8x128xf32>
    %32 = arith.minimumf %30, %31 : vector<8x128xf32>
    %33 = arith.select %28, %32, %22 : vector<8x128xi1>, vector<8x128xf32>
    %34 = tpu.transpose %33, [1, 0] : vector<8x128xf32> -> vector<128x8xf32>
    %35 = vector.extract_strided_slice %34 {offsets = [0, 0], sizes = [8, 8], strides = [1, 1]} : vector<128x8xf32> to vector<8x8xf32>
    %c0_19 = arith.constant 0 : index
    %c0_20 = arith.constant 0 : index
    %36 = vector.load %arg8[%c0_19, %c0_20] : memref<8x8xf32, #tpu.memory_space<vmem>>, vector<8x8xf32>
    tpu.vector_store %arg8[%c0_19, %c0_20], %35 {strides = array<i32>} : memref<8x8xf32, #tpu.memory_space<vmem>>, vector<8x8xf32>,
    return
  }
  func.func @transform_0(%arg0: i32) -> (i32, i32) {
    %c0_i32 = arith.constant 0 : i32
    %c0_i32_0 = arith.constant 0 : i32
    return %arg0, %c0_i32 : i32, i32
  }
  func.func @transform_1(%arg0: i32) -> (i32, i32) {
    %c0_i32 = arith.constant 0 : i32
    %c0_i32_0 = arith.constant 0 : i32
    %c0_i32_1 = arith.constant 0 : i32
    return %c0_i32, %c0_i32_0 : i32, i32
  }
  func.func @transform_2(%arg0: i32) -> (i32, i32) {
    %c0_i32 = arith.constant 0 : i32
    %c0_i32_0 = arith.constant 0 : i32
    %c0_i32_1 = arith.constant 0 : i32
    return %c0_i32, %c0_i32_0 : i32, i32
  }
  func.func @transform_3(%arg0: i32) -> (i32, i32) {
    %c0_i32 = arith.constant 0 : i32
    %c0_i32_0 = arith.constant 0 : i32
    %c0_i32_1 = arith.constant 0 : i32
    return %c0_i32, %c0_i32_0 : i32, i32
  }
  func.func @transform_4(%arg0: i32) -> (i32, i32) {
    %c0_i32 = arith.constant 0 : i32
    %c0_i32_0 = arith.constant 0 : i32
    %c0_i32_1 = arith.constant 0 : i32
    return %c0_i32, %c0_i32_0 : i32, i32
  }
  func.func @transform_5(%arg0: i32) -> (i32, i32) {
    %c0_i32 = arith.constant 0 : i32
    %c0_i32_0 = arith.constant 0 : i32
    %c0_i32_1 = arith.constant 0 : i32
    return %c0_i32, %c0_i32_0 : i32, i32
  }
  func.func @transform_6(%arg0: i32) -> (i32, i32) {
    %c0_i32 = arith.constant 0 : i32
    %c0_i32_0 = arith.constant 0 : i32
    %c0_i32_1 = arith.constant 0 : i32
    return %c0_i32, %c0_i32_0 : i32, i32
  }
  func.func @transform_7(%arg0: i32) -> (i32, i32) {
    %c0_i32 = arith.constant 0 : i32
    %c0_i32_0 = arith.constant 0 : i32
    return %c0_i32, %arg0 : i32, i32
  }
}

</mosaic_0001>

<bundles_post_ra>
// kernel: tpu_custom_call.1
= control target key start
LH: loop header
LB: loop body
LE: loop exit
PB: predicated region body
PF: predicated region fallthrough
CT: control target
= control target key end

     0   :  { %12 = vsyncpa [#allocation3], 0  ;;  %s588_s0 = inlined_call_operand.hbm [shape: f32[8,16], index: 0, kind: input, shape index: {}]   ;;  %s589_s1 = inlined_call_operand.hbm [shape: bf16[16,32], index: 1, kind: input, shape index: {}]   ;;  %s590_s2 = inlined_call_operand.vmem [shape: f32[1,32], index: 2, kind: input, shape index: {}]   ;;  %s591_s3 = inlined_call_operand.hbm [shape: bf16[32,32], index: 3, kind: input, shape index: {}]   ;;  %s592_s4 = inlined_call_operand.vmem [shape: f32[1,32], index: 4, kind: input, shape index: {}]   ;;  %s593_s5 = inlined_call_operand.vmem [shape: bf16[32,128], index: 5, kind: input, shape index: {}]   ;;  %s594_s6 = inlined_call_operand.vmem [shape: f32[1,128], index: 6, kind: input, shape index: {}]   ;;  %s595_s7 = inlined_call_operand.hbm [shape: f32[8,8], index: 7, kind: output, shape index: {}]  }
   0x1   :  { %13 = vsyncpa [#allocation6], 0 }
   0x2   :  { %14 = vsyncpa [#allocation4], 0  ;;  %s471_s24 = smov [#allocation5]   ;;  %s377_s28 = scalar_lea.hbm %s589_s1, 128 }
   0x3   :  { %s30_s25 = sshll.u32 %s471_s24, 4  ;;  %p378_p0 = scmp.ne.s32.totalorder %s589_s1, %s377_s28  ;;  %s31_s25 = int_to_ptr.vmem [resolvable:$true] %s30_s25 }
   0x4   :  { %p381_p1 = scmp.lt.u32.totalorder %s377_s28, %s589_s1 }
   0x6   :  { %p383_p2 = pnand %p381_p1, %p378_p0 }
   0x8   :  { %386 = shalt.err (!%p383_p2)
}
   0x9   :  { %s387_s10 = scalar_lea.vmem %s31_s25, 128  ;;  %p392_p4 = scmp.lt.s32.totalorder %s31_s25, %s31_s25 }
   0xa   :  { %p388_p3 = scmp.ne.s32.totalorder %s31_s25, %s387_s10  ;;  %p393_p5 = scmp.lt.s32.totalorder %s387_s10, %s387_s10 }
   0xc   :  { %p394_p6 = por %p393_p5, %p392_p4 }
   0xe   :  { %p395_p7 = pnand %p394_p6, %p388_p3 }
  0x10   :  { %398 = shalt.err (!%p395_p7)
}
  0x11   :  { %s472_s11 = smov 64   ;;  %s473_s12 = smov 4  }
  0x12   :  { %36 = dma.hbm_to_vmem [thread:$0]  %s589_s1, 128, %s31_s25, [#allocation6], %s472_s11, %s472_s11, %s473_s12  }
  0x13   :  { %s474_s15 = smov [#allocation2]   ;;  %s475_s17 = smov [#allocation7]  }
  0x14   :  { %s21_s16 = sshll.u32 %s474_s15, 4  ;;  %s44_s18 = sshll.u32 %s475_s17, 4  ;;  %s22_s16 = int_to_ptr.vmem [resolvable:$true] %s21_s16  ;;  %s45_s18 = int_to_ptr.vmem [resolvable:$true] %s44_s18 }
  0x15   :  { %s399_s21 = scalar_lea.hbm %s588_s0, 128 }
  0x16   :  { %p400_p8 = scmp.ne.s32.totalorder %s588_s0, %s399_s21  ;;  %p403_p9 = scmp.lt.u32.totalorder %s399_s21, %s588_s0 }
  0x18   :  { %p405_p10 = pnand %p403_p9, %p400_p8 }
  0x1a   :  { %408 = shalt.err (!%p405_p10)
}
  0x1b   :  { %s409_s1 = scalar_lea.vmem %s22_s16, 128  ;;  %p414_p12 = scmp.lt.s32.totalorder %s22_s16, %s22_s16 }
  0x1c   :  { %p410_p11 = scmp.ne.s32.totalorder %s22_s16, %s409_s1  ;;  %p415_p13 = scmp.lt.s32.totalorder %s409_s1, %s409_s1 }
  0x1e   :  { %p416_p0 = por %p415_p13, %p414_p12 }
  0x20   :  { %p417_p1 = pnand %p416_p0, %p410_p11 }
  0x22   :  { %420 = shalt.err (!%p417_p1)
}
  0x23   :  { %24 = dma.hbm_to_vmem [thread:$0]  %s588_s0, 128, %s22_s16, [#allocation3]  }
  0x24   :  { %s421_s30 = scalar_lea.hbm %s591_s3, 256 }
  0x25   :  { %p422_p2 = scmp.ne.s32.totalorder %s591_s3, %s421_s30  ;;  %p425_p3 = scmp.lt.u32.totalorder %s421_s30, %s591_s3 }
  0x27   :  { %p427_p4 = pnand %p425_p3, %p422_p2 }
  0x29   :  { %430 = shalt.err (!%p427_p4)
}
  0x2a   :  { %s431_s14 = scalar_lea.vmem %s45_s18, 256  ;;  %p436_p6 = scmp.lt.s32.totalorder %s45_s18, %s45_s18 }
  0x2b   :  { %p432_p5 = scmp.ne.s32.totalorder %s45_s18, %s431_s14  ;;  %p437_p7 = scmp.lt.s32.totalorder %s431_s14, %s431_s14 }
  0x2d   :  { %p438_p8 = por %p437_p7, %p436_p6 }
  0x2f   :  { %p439_p9 = pnand %p438_p8, %p432_p5 }
  0x31   :  { %442 = shalt.err (!%p439_p9)
}
  0x32   :  { %50 = dma.hbm_to_vmem [thread:$0]  %s591_s3, 256, %s45_s18, [#allocation6], %s472_s11, %s472_s11, %s473_s12  }
  0x33   :  { %465 = dma.done.wait [#allocation3], 128  }
  0x34   :  { %466 = vsyncadd [#allocation3], 4294967168 }
  0x35   :  { %467 = dma.done.wait [#allocation6], 384  }
  0x36   :  { %468 = vsyncadd [#allocation6], 4294966912  ;;  %v476_v0 = vmov 0.0   ;;  %vm477_vm0 = vmmov 0   ;;  %v372_v1 = vld [vmem:[#allocation5] sm:$0xff]   ;;  %v67_v2 = vld [vmem:[#allocation2] sm:$0xff]  ;;  %v265_v24 = vlaneseq }
  0x37   :  { %342 = vmatprep.subr.bf16.mxu0 %v476_v0  ;;  %344 = vmatprep.mubr.msk.bf16.mxu0 %vm477_vm0, %v476_v0  ;;  %vm84_vm1 = vcmask 130048   ;;  %v68_v3 = vpack.c.bf16 %v67_v2, %v67_v2  ;;  %v373_v4 = vld [vmem:[#allocation7] sm:$0xff]   ;;  %v374_v5 = vld [vmem:[#allocation7 + $0x8] sm:$0xff]   ;;  %vm153_vm2 = vcmask 261120   ;;  %vm305_vm6 = vcmask 64512  }
  0x38   :  { %348 = vmatprep.subr.bf16.mxu1 %v476_v0  ;;  %352 = vmatprep.mubr.msk.bf16.mxu1 %vm477_vm0, %v476_v0  ;;  %v375_v6 = vld [vmem:[%s593_s5] sm:$0xff]   ;;  %v376_v15 = vld [vmem:[%s593_s5 + $0x8] sm:$0xff]   ;;  %v266_v25 = vand.u32 127, %v265_v24 }
  0x39   :  { %343 = vmatpush3.bf16.msra.mxu0 %v372_v1  ;;  %349 = vmatpush3.bf16.msra.mxu1 %v373_v4  ;;  %v323_v7 = vld [vmem:[%s590_s2] ss:$0 sm:$0xff] }
  0x3a   :  { %356 = vmatprep.subr.bf16.mxu0 %v476_v0  ;;  %350 = vmatprep.subr.bf16.mxu1 %v476_v0  ;;  %v326_v16 = vld [vmem:[%s592_s4] ss:$0 sm:$0xff]  ;;  %vm267_vm3 = vcmp.ge.s32.totalorder %v266_v25, 4  ;;  %vm268_vm4 = vcmp.lt.s32.totalorder %v266_v25, 8  ;;  %s478_s4 = smov [#allocation8]  }
  0x3b   :  { %v330_v26 = vld [vmem:[%s594_s6] ss:$0 sm:$0xff]  ;;  %vm269_vm5 = vmand %vm267_vm3, %vm268_vm4  ;;  %s313_s5 = sshll.u32 %s478_s4, 4  ;;  %s314_s5 = int_to_ptr.vmem [resolvable:$true] %s313_s5 }
  0x3c   :  { %345 = vmatmul.mubr.msk.bf16.vlgmr.msra.gmra.mrb[0].mxu0 %vm84_vm1, %v68_v3  ;;  %s443_s22 = scalar_lea.vmem %s314_s5, 128  ;;  %p448_p11 = scmp.lt.s32.totalorder %s314_s5, %s314_s5 }
  0x3d   :  { %360 = vmatprep.mubr.msk.bf16.mxu0 %vm477_vm0, %v476_v0  ;;  %351 = vmatpush3.bf16.msra.mxu1 %v374_v5  ;;  %p444_p10 = scmp.ne.s32.totalorder %s314_s5, %s443_s22  ;;  %p449_p12 = scmp.lt.s32.totalorder %s443_s22, %s443_s22 }
  0x3e   :  { %357 = vmatpush3.bf16.msra.mxu0 %v375_v6 }
  0x3f   :  { %358 = vmatprep.subr.bf16.mxu0 %v476_v0  ;;  %p450_p13 = por %p449_p12, %p448_p11 }
  0x41   :  { %p451_p0 = pnand %p450_p13, %p444_p10 }
  0x42   :  { %359 = vmatpush3.bf16.msra.mxu0 %v376_v15 }
 0x10f   :  { %v122_v8 = vpop.f32.mrb[0].mxu0 }
 0x110   :  { %v123_v9 = vadd.f32 %v323_v7, %v122_v8  ;;  %v346_v10 = vpop.f32.mrb[1].mxu0 }
 0x111   :  { %v125_v11 = vpop.f32.mrb[2].mxu0 }
 0x112   :  { %v128_v12 = vmax.f32 %v123_v9, 0.0  ;;  %v347_v13 = vpop.f32.mrb[3].mxu0 }
 0x114   :  { %v129_v14 = vpack.c.bf16 %v128_v12, %v128_v12 }
 0x116   :  { %353 = vmatmul.mubr.msk.bf16.vlgmr.msra.gmra.mrb[0].mxu1 %vm153_vm2, %v129_v14 }
 0x1e9   :  { %v191_v17 = vpop.f32.mrb[0].mxu1 }
 0x1ea   :  { %v192_v18 = vadd.f32 %v326_v16, %v191_v17  ;;  %v354_v19 = vpop.f32.mrb[1].mxu1 }
 0x1eb   :  { %v194_v20 = vpop.f32.mrb[2].mxu1 }
 0x1ec   :  { %v197_v21 = vmax.f32 %v192_v18, 0.0  ;;  %v355_v22 = vpop.f32.mrb[3].mxu1 }
 0x1ee   :  { %v198_v23 = vpack.c.bf16 %v197_v21, %v197_v21 }
 0x1f0   :  { %361 = vmatmul.mubr.msk.bf16.vlgmr.msra.gmra.mrb[4].mxu0 %vm153_vm2, %v198_v23 }
 0x2c3   :  { %v259_v27 = vpop.f32.mrb[4].mxu0 }
 0x2c4   :  { %v260_v28 = vadd.f32 %v330_v26, %v259_v27  ;;  %v362_v29 = vpop.f32.mrb[5].mxu0 }
 0x2c5   :  { %v262_v30 = vpop.f32.mrb[6].mxu0 }
 0x2c6   :  { %v270_v31 = vmax.f32 %v260_v28, 0.0  ;;  %v363_v32 = vpop.f32.mrb[7].mxu0 }
 0x2c8   :  { %v271_v33 = vmin.f32 %v270_v31, 2.0 }
 0x2ca   :  { %v272_v34 = vsel %vm269_vm5, %v271_v33, %v260_v28 }
 0x2cb   :  { %273 = vxpose.xlu0.b32.start.end [1/1] (short) (narrow) %v272_v34, 8 }
 0x34b   :  { %v289_v35 = vpop.trf.xlu0 }
 0x34c   :  { %306 = vst.msk [vmem:[#allocation8] sm:$0xff] %vm305_vm6, %v289_v35 }
 0x34d   :  { %454 = shalt.err (!%p451_p0)
}
 0x34e   :  { %s455_s24 = scalar_lea.hbm %s595_s7, 128 }
 0x34f   :  { %p456_p1 = scmp.ne.s32.totalorder %s595_s7, %s455_s24  ;;  %p459_p2 = scmp.lt.u32.totalorder %s455_s24, %s595_s7 }
 0x351   :  { %p461_p3 = pnand %p459_p2, %p456_p1 }
 0x353   :  { %464 = shalt.err (!%p461_p3)
}
 0x354   :  { %316 = dma.vmem_to_hbm [thread:$0]  %s314_s5, 128, %s595_s7, [#allocation4]  }
 0x355   :  { %469 = dma.done.wait [#allocation4], 128  }
 0x356   :  { %470 = vsyncadd [#allocation4], 4294967168 }
 0x357   :  { %320 = vsyncpa [#allocation3], 1 }
 0x358   :  { %321 = vsyncpa [#allocation6], 1 }
 0x359   :  { %322 = vsyncpa [#allocation4], 1 }

</bundles_post_ra>
